<compile_context>
chip_gen: v7x
topology: tpu7x:2x2x1
jax: 0.10.0
libtpu: 0.0.40
codegen_flags: <defaults>
</compile_context>

<pallas_src>
import functools

import numpy as np
import jax
import jax.numpy as jnp
from jax.experimental import pallas as pl
from jax.experimental.pallas import tpu as pltpu


def _round_up(v: int, m: int) -> int:
    return (v + m - 1) // m * m


def _gmm_kernel(x_ref, a_ref, b_ref, c_ref, out_ref, *, n_rows: int):
    # x_ref:   (TB, D)       batch tile (D = natural feature dim, un-padded)
    # a_ref:   (D, Npad)     -0.5 * prec.T           (N padded with zeros)
    # b_ref:   (D, Npad)     (mu * prec).T           (N padded with zeros)
    # c_ref:   (1, Npad)     per-component constant  (N padded with -1e30)
    # out_ref: (1, TB)       log-likelihood per batch element (lane-dense)
    x = x_ref[...]                                         # (TB, D) f32

    # Two MXU matmuls with f32 accumulation (K = D is small; MXU pads it).
    logits = (jnp.dot(x * x, a_ref[...], preferred_element_type=jnp.float32)
              + jnp.dot(x, b_ref[...], preferred_element_type=jnp.float32)
              + c_ref[...])                                # (TB, Npad)

    # Transpose so the batch axis is the lane axis (lane-dense (1, TB) store),
    # then slice to the real component rows so exp/reduce work scales with
    # ceil(N/8) sublane tiles instead of Npad/8.
    lt = jnp.transpose(logits)[:n_rows, :]                 # (Nr, TB)
    m = jnp.max(lt, axis=0, keepdims=True)                 # (1, TB)
    s = jnp.sum(jnp.exp(lt - m), axis=0, keepdims=True)    # (1, TB)
    out_ref[...] = m + jnp.log(s)


def gaussian_mixture_log_prob(x, weights, means, cov, *, tile_b=1024):
    """Evaluate GMM log-likelihood, matching the PyTorch module's forward.

    Args:
        x:       (..., D)
        weights: (N,)
        means:   (N, D)
        cov:     (N, D) diagonal covariances
    Returns:
        log-likelihood of shape (...)
    """
    assert tile_b >= 128 and tile_b % 128 == 0, "tile_b must be a multiple of 128"
    N, D = means.shape
    assert x.shape[-1] == D
    lead_shape = x.shape[:-1]
    xf = x.reshape(-1, D).astype(jnp.float32)              # no padding of x
    B = xf.shape[0]
    if B == 0:
        return jnp.zeros(lead_shape, jnp.float32)

    Npad = _round_up(N, 128)       # component (lane) dim of the weight blocks
    Nr = _round_up(N, 8)           # sublane rows kept in the in-kernel softmax

    # --- batch tile selection ------------------------------------------------
    tile_b = min(tile_b, _round_up(B, 128))                # never exceed batch
    # v7x has 2 TensorCores splitting the single "parallel" axis: prefer >= 4
    # grid steps when the batch is big enough (no effect on v5e/v6e).
    if B >= 4 * 128 and pl.cdiv(B, tile_b) < 4:
        tile_b = max(128, _round_up(pl.cdiv(B, 4), 128))

    def vmem_estimate(tb):
        return 4 * (2 * tb * D            # x double buffer
                    + 4 * D * Npad        # A, Bm (resident, 2 bufs each)
                    + 2 * Npad            # const
                    + 2 * tb              # out double buffer
                    + 4 * tb * Npad)      # logits / transpose / exp temporaries

    # Keep the footprint comfortable on v7x (64 MiB/TC physical, 32 MiB default
    # scoped) and v5e (16 MiB default scoped).
    while tile_b > 128 and vmem_estimate(tile_b) > 24 * (1 << 20):
        tile_b = max(128, _round_up(tile_b // 2, 128))

    # --- parameter folding (tiny, plain JAX) ----------------------------------
    w = weights.astype(jnp.float32)
    mu = means.astype(jnp.float32)
    cv = cov.astype(jnp.float32)
    sinv = jax.lax.rsqrt(cv)                               # (N, D)
    prec = sinv * sinv                                     # 1 / cov
    A = -0.5 * prec.T                                      # (D, N)
    Bm = (mu * prec).T                                     # (D, N)
    norm_constant = jnp.float32(0.5 * D * np.log(2.0 * np.pi))
    const = (jnp.log(w)
             + jnp.sum(jnp.log(sinv), axis=-1)
             - norm_constant
             - 0.5 * jnp.sum(mu * mu * prec, axis=-1))     # (N,)

    # Pad only the component axis to full lanes (parameters are tiny).
    A = jnp.pad(A, ((0, 0), (0, Npad - N)))
    Bm = jnp.pad(Bm, ((0, 0), (0, Npad - N)))
    const = jnp.pad(const, (0, Npad - N), constant_values=-1e30).reshape(1, Npad)

    grid = (pl.cdiv(B, tile_b),)
    cost = pl.CostEstimate(
        flops=int(4 * B * D * Npad),                       # two matmuls
        transcendentals=int(B * Nr + B),                   # exp + log
        bytes_accessed=int(4 * (B * D + 2 * D * Npad + Npad + B)),
    )

    compiler_kwargs = dict(dimension_semantics=("parallel",))
    est = vmem_estimate(tile_b)
    if est > 12 * (1 << 20):
        # Only raise the scoped-VMEM limit when the estimate actually needs it
        # (v5e default is 16 MiB); cap well below v7x's 64 MiB/TC physical.
        compiler_kwargs["vmem_limit_bytes"] = int(min(2 * est, 48 * (1 << 20)))

    out = pl.pallas_call(
        functools.partial(_gmm_kernel, n_rows=Nr),
        out_shape=jax.ShapeDtypeStruct((1, B), jnp.float32),
        grid_spec=pltpu.PrefetchScalarGridSpec(
            num_scalar_prefetch=0,
            grid=grid,
            in_specs=[
                pl.BlockSpec((tile_b, D), lambda i: (i, 0)),   # x tile (no pad)
                pl.BlockSpec((D, Npad), lambda i: (0, 0)),     # A   (resident)
                pl.BlockSpec((D, Npad), lambda i: (0, 0)),     # Bm  (resident)
                pl.BlockSpec((1, Npad), lambda i: (0, 0)),     # const (resident)
            ],
            out_specs=pl.BlockSpec((1, tile_b), lambda i: (0, i)),
        ),
        compiler_params=pltpu.CompilerParams(**compiler_kwargs),
        cost_estimate=cost,
    )(xf, A, Bm, const)

    return out[0].reshape(lead_shape)


def _reference_log_prob(x, weights, means, cov):
    """Pure-JAX reference mirroring the PyTorch forward."""
    scales_inv = jax.lax.rsqrt(cov)
    D = means.shape[-1]
    norm_constant = 0.5 * D * np.log(2.0 * np.pi)
    delta = x[..., None, :] - means
    weight_term = jnp.log(weights)
    exponential_term = -0.5 * jnp.sum((delta * scales_inv) ** 2, axis=-1)
    normalization_term = jnp.sum(jnp.log(scales_inv), axis=-1) - norm_constant
    return jax.scipy.special.logsumexp(
        weight_term + exponential_term + normalization_term, axis=-1)


if __name__ == "__main__":
    key = jax.random.PRNGKey(0)
    k1, k2, k3, k4, k5, k6, k7, k8 = jax.random.split(key, 8)

    # --- Case 1: N=8 components, D=32 features, x leading dims (2, 16). -----
    N, D = 8, 32
    batch_shape = (2, 16)
    raw_w = jax.random.uniform(k1, (N,), jnp.float32, 0.1, 1.0)
    weights = raw_w / jnp.sum(raw_w)                               # (N,)
    means = jax.random.normal(k2, (N, D), jnp.float32)             # (N, D)
    cov = jax.random.uniform(k3, (N, D), jnp.float32, 0.5, 1.5)    # (N, D)
    x = jax.random.normal(k4, batch_shape + (D,), jnp.float32)     # (..., D)

    out = jax.block_until_ready(gaussian_mixture_log_prob(x, weights, means, cov))
    ref = _reference_log_prob(x, weights, means, cov)
    assert out.shape == batch_shape
    # atol slightly relaxed vs 1e-5: MXU f32 accumulation order + the expanded
    # quadratic form differ from the elementwise reference at ~1e-5 absolute.
    np.testing.assert_allclose(np.asarray(out), np.asarray(ref),
                               rtol=1e-5, atol=1e-4)

    # --- Case 2: ragged sizes (B not a multiple of 128 with >1 grid step, N
    # not a multiple of 8, D a plain multiple of 8) to exercise the
    # un-padded-x / edge-block path requested by the review. ------------------
    N2, D2, B2 = 5, 24, 150
    raw_w2 = jax.random.uniform(k5, (N2,), jnp.float32, 0.1, 1.0)
    weights2 = raw_w2 / jnp.sum(raw_w2)
    means2 = jax.random.normal(k6, (N2, D2), jnp.float32)
    cov2 = jax.random.uniform(k7, (N2, D2), jnp.float32, 0.5, 1.5)
    x2 = jax.random.normal(k8, (B2, D2), jnp.float32)
    out2 = jax.block_until_ready(
        gaussian_mixture_log_prob(x2, weights2, means2, cov2, tile_b=128))
    ref2 = _reference_log_prob(x2, weights2, means2, cov2)
    assert out2.shape == (B2,)
    np.testing.assert_allclose(np.asarray(out2), np.asarray(ref2),
                               rtol=1e-5, atol=1e-4)

    print("KERNEL_OK")
</pallas_src>

<mosaic_0001>
module attributes {stable_mosaic.version = 11 : i64} {
  func.func @_gmm_kernel(%arg0: i32, %arg1: memref<128x32xf32, #tpu.memory_space<vmem>>, %arg2: memref<32x128xf32, #tpu.memory_space<vmem>>, %arg3: memref<32x128xf32, #tpu.memory_space<vmem>>, %arg4: memref<1x128xf32, #tpu.memory_space<vmem>>, %arg5: memref<1x128xf32, #tpu.memory_space<vmem>>) attributes {dimension_semantics = [#tpu.dimension_semantics<parallel>], iteration_bounds = array<i64: 1>, scalar_prefetch = 0 : i64, scratch_operands = 0 : i64, tpu.core_type = #tpu.core_type<tc>, window_params = [{transform_indices = @transform_0, window_bounds = array<i64: 128, 32>}, {pipeline_mode = #tpu.pipeline_mode<synchronous>, transform_indices = @transform_1, window_bounds = array<i64: 32, 128>}, {pipeline_mode = #tpu.pipeline_mode<synchronous>, transform_indices = @transform_2, window_bounds = array<i64: 32, 128>}, {pipeline_mode = #tpu.pipeline_mode<synchronous>, transform_indices = @transform_3, window_bounds = array<i64: 1, 128>}, {transform_indices = @transform_4, window_bounds = array<i64: 1, 128>}]} {
    %c0 = arith.constant 0 : index
    %c0_0 = arith.constant 0 : index
    %0 = vector.load %arg1[%c0, %c0_0] : memref<128x32xf32, #tpu.memory_space<vmem>>, vector<128x32xf32>
    %1 = arith.mulf %0, %0 : vector<128x32xf32>
    %c0_1 = arith.constant 0 : index
    %c0_2 = arith.constant 0 : index
    %2 = vector.load %arg2[%c0_1, %c0_2] : memref<32x128xf32, #tpu.memory_space<vmem>>, vector<32x128xf32>
    %cst = arith.constant dense<0.000000e+00> : vector<128x128xf32>
    %3 = tpu.matmul %1, %2, %cst {dimension_numbers = #tpu.dot_dimension_numbers<[1], [0], [0], [1], [0, 0, 1, 1], [], []>} : vector<128x32xf32>, vector<32x128xf32>, vector<128x128xf32> -> vector<128x128xf32>
    %c0_3 = arith.constant 0 : index
    %c0_4 = arith.constant 0 : index
    %4 = vector.load %arg3[%c0_3, %c0_4] : memref<32x128xf32, #tpu.memory_space<vmem>>, vector<32x128xf32>
    %cst_5 = arith.constant dense<0.000000e+00> : vector<128x128xf32>
    %5 = tpu.matmul %0, %4, %cst_5 {dimension_numbers = #tpu.dot_dimension_numbers<[1], [0], [0], [1], [0, 0, 1, 1], [], []>} : vector<128x32xf32>, vector<32x128xf32>, vector<128x128xf32> -> vector<128x128xf32>
    %6 = arith.addf %3, %5 : vector<128x128xf32>
    %c0_6 = arith.constant 0 : index
    %c0_7 = arith.constant 0 : index
    %7 = vector.load %arg4[%c0_6, %c0_7] : memref<1x128xf32, #tpu.memory_space<vmem>>, vector<1x128xf32>
    %8 = vector.broadcast %7 : vector<1x128xf32> to vector<128x128xf32>
    %9 = arith.addf %6, %8 : vector<128x128xf32>
    %10 = tpu.transpose %9, [1, 0] : vector<128x128xf32> -> vector<128x128xf32>
    %11 = vector.extract_strided_slice %10 {offsets = [0, 0], sizes = [8, 128], strides = [1, 1]} : vector<128x128xf32> to vector<8x128xf32>
    %cst_8 = arith.constant dense<0xFF800000> : vector<128xf32>
    %12 = vector.multi_reduction <maximumf>, %11, %cst_8 [0] : vector<8x128xf32> to vector<128xf32>
    %13 = vector.shape_cast %12 : vector<128xf32> to vector<1x128xf32>
    %14 = vector.broadcast %13 : vector<1x128xf32> to vector<8x128xf32>
    %15 = arith.subf %11, %14 : vector<8x128xf32>
    %16 = math.exp %15 : vector<8x128xf32>
    %cst_9 = arith.constant dense<0.000000e+00> : vector<128xf32>
    %17 = vector.multi_reduction <add>, %16, %cst_9 [0] : vector<8x128xf32> to vector<128xf32>
    %18 = vector.shape_cast %17 : vector<128xf32> to vector<1x128xf32>
    %19 = math.log %18 : vector<1x128xf32>
    %20 = arith.addf %13, %19 : vector<1x128xf32>
    %c0_10 = arith.constant 0 : index
    %c0_11 = arith.constant 0 : index
    %21 = vector.load %arg5[%c0_10, %c0_11] : memref<1x128xf32, #tpu.memory_space<vmem>>, vector<1x128xf32>
    tpu.vector_store %arg5[%c0_10, %c0_11], %20 {strides = array<i32>} : memref<1x128xf32, #tpu.memory_space<vmem>>, vector<1x128xf32>,
    return
  }
  func.func @transform_0(%arg0: i32) -> (i32, i32) {
    %c0_i32 = arith.constant 0 : i32
    %c0_i32_0 = arith.constant 0 : i32
    return %arg0, %c0_i32 : i32, i32
  }
  func.func @transform_1(%arg0: i32) -> (i32, i32) {
    %c0_i32 = arith.constant 0 : i32
    %c0_i32_0 = arith.constant 0 : i32
    %c0_i32_1 = arith.constant 0 : i32
    return %c0_i32, %c0_i32_0 : i32, i32
  }
  func.func @transform_2(%arg0: i32) -> (i32, i32) {
    %c0_i32 = arith.constant 0 : i32
    %c0_i32_0 = arith.constant 0 : i32
    %c0_i32_1 = arith.constant 0 : i32
    return %c0_i32, %c0_i32_0 : i32, i32
  }
  func.func @transform_3(%arg0: i32) -> (i32, i32) {
    %c0_i32 = arith.constant 0 : i32
    %c0_i32_0 = arith.constant 0 : i32
    %c0_i32_1 = arith.constant 0 : i32
    return %c0_i32, %c0_i32_0 : i32, i32
  }
  func.func @transform_4(%arg0: i32) -> (i32, i32) {
    %c0_i32 = arith.constant 0 : i32
    %c0_i32_0 = arith.constant 0 : i32
    return %c0_i32, %arg0 : i32, i32
  }
}

</mosaic_0001>

<bundles_post_ra>
// kernel: tpu_custom_call.1
= control target key start
LH: loop header
LB: loop body
LE: loop exit
PB: predicated region body
PF: predicated region fallthrough
CT: control target
= control target key end

     0   :  { %9 = vsyncpa [#allocation3], 0  ;;  %s998_s0 = inlined_call_operand.hbm [shape: f32[32,32], index: 0, kind: input, shape index: {}]   ;;  %s999_s1 = inlined_call_operand.hbm [shape: f32[32,128], index: 1, kind: input, shape index: {}]   ;;  %s1000_s2 = inlined_call_operand.hbm [shape: f32[32,128], index: 2, kind: input, shape index: {}]   ;;  %s1001_s3 = inlined_call_operand.vmem [shape: f32[1,128], index: 3, kind: input, shape index: {}]   ;;  %s1002_s4 = inlined_call_operand.hbm [shape: f32[1,32], index: 4, kind: output, shape index: {}]  }
   0x1   :  { %10 = vsyncpa [#allocation6], 0 }
   0x2   :  { %11 = vsyncpa [#allocation4], 0 }
   0x3   :  { %16 = vsyncadd [#allocation3], 1536  ;;  %s849_s15 = smov [#allocation5]   ;;  %s850_s17 = smov [#allocation2]  }
   0x4   :  { %s29_s16 = sshll.u32 %s849_s15, 4  ;;  %s17_s18 = sshll.u32 %s850_s17, 4  ;;  %s30_s16 = int_to_ptr.vmem [resolvable:$true] %s29_s16  ;;  %s880_s18 = int_to_ptr.vmem [resolvable:$true] %s17_s18 }
   0x5   :  { %s755_s21 = scalar_lea.hbm %s999_s1, 512 }
   0x6   :  { %p756_p0 = scmp.ne.s32.totalorder %s999_s1, %s755_s21  ;;  %p759_p1 = scmp.lt.u32.totalorder %s755_s21, %s999_s1 }
   0x8   :  { %p761_p2 = pnand %p759_p1, %p756_p0 }
   0xa   :  { %764 = shalt.err (!%p761_p2)
}
   0xb   :  { %s765_s26 = scalar_lea.vmem %s30_s16, 512  ;;  %p770_p4 = scmp.lt.s32.totalorder %s30_s16, %s30_s16 }
   0xc   :  { %p766_p3 = scmp.ne.s32.totalorder %s30_s16, %s765_s26  ;;  %p771_p5 = scmp.lt.s32.totalorder %s765_s26, %s765_s26 }
   0xe   :  { %p772_p6 = por %p771_p5, %p770_p4 }
  0x10   :  { %p773_p7 = pnand %p772_p6, %p766_p3 }
  0x12   :  { %776 = shalt.err (!%p773_p7)
}
  0x13   :  { %s851_s27 = smov 128   ;;  %s852_s28 = smov 8  }
  0x14   :  { %35 = dma.hbm_to_vmem [thread:$0]  %s999_s1, 512, %s30_s16, [#allocation6], %s851_s27, %s851_s27, %s852_s28  }
  0x15   :  { %s777_s7 = scalar_lea.hbm %s998_s0, 512 }
  0x16   :  { %p778_p8 = scmp.ne.s32.totalorder %s998_s0, %s777_s7  ;;  %p781_p9 = scmp.lt.u32.totalorder %s777_s7, %s998_s0 }
  0x18   :  { %p783_p10 = pnand %p781_p9, %p778_p8 }
  0x1a   :  { %786 = shalt.err (!%p783_p10)
}
  0x1b   :  { %s787_s12 = scalar_lea.vmem %s880_s18, 512  ;;  %s791_s1 = scalar_lea.vmem %s880_s18, 2048 }
  0x1c   :  { %p788_p11 = scmp.ne.s32.totalorder %s880_s18, %s787_s12  ;;  %p792_p12 = scmp.lt.s32.totalorder %s880_s18, %s880_s18 }
  0x1d   :  { %p793_p13 = scmp.lt.s32.totalorder %s791_s1, %s787_s12 }
  0x1f   :  { %p794_p0 = por %p793_p13, %p792_p12 }
  0x21   :  { %p795_p1 = pnand %p794_p0, %p788_p11 }
  0x23   :  { %798 = shalt.err (!%p795_p1)
}
  0x24   :  { %23 = dma.hbm_to_vmem [thread:$0]  %s998_s0, 512, %s880_s18, [#allocation3], %s851_s27, %s851_s27, %s852_s28  }
  0x25   :  { %s853_s15 = smov [#allocation7]   ;;  %s799_s20 = scalar_lea.hbm %s1000_s2, 512 }
  0x26   :  { %s41_s16 = sshll.u32 %s853_s15, 4  ;;  %p800_p2 = scmp.ne.s32.totalorder %s1000_s2, %s799_s20  ;;  %s42_s16 = int_to_ptr.vmem [resolvable:$true] %s41_s16 }
  0x27   :  { %p803_p3 = scmp.lt.u32.totalorder %s799_s20, %s1000_s2 }
  0x29   :  { %p805_p4 = pnand %p803_p3, %p800_p2 }
  0x2b   :  { %808 = shalt.err (!%p805_p4)
}
  0x2c   :  { %s809_s25 = scalar_lea.vmem %s42_s16, 512  ;;  %p814_p6 = scmp.lt.s32.totalorder %s42_s16, %s42_s16 }
  0x2d   :  { %p810_p5 = scmp.ne.s32.totalorder %s42_s16, %s809_s25  ;;  %p815_p7 = scmp.lt.s32.totalorder %s809_s25, %s809_s25 }
  0x2f   :  { %p816_p8 = por %p815_p7, %p814_p6 }
  0x31   :  { %p817_p9 = pnand %p816_p8, %p810_p5 }
  0x33   :  { %820 = shalt.err (!%p817_p9)
}
  0x34   :  { %47 = dma.hbm_to_vmem [thread:$0]  %s1000_s2, 512, %s42_s16, [#allocation6], %s851_s27, %s851_s27, %s852_s28  }
  0x35   :  { %843 = dma.done.wait [#allocation3], 2048  }
  0x36   :  { %844 = vsyncadd [#allocation3], 4294965248 }
  0x37   :  { %845 = dma.done.wait [#allocation6], 1024  }
  0x38   :  { %846 = vsyncadd [#allocation6], 4294966272  ;;  %v95_v0 = vld [vmem:[#allocation7] sm:$0xff]  ;;  %v96_v1 = vld [vmem:[#allocation7 + $0x8] sm:$0xff]  ;;  %vm99_vm0 = vcmask 261120  }
  0x39   :  { %v91_v2 = vld [vmem:[#allocation5] sm:$0xff]  ;;  %v713_v3 = vpack.c.bf16 %v96_v1, %v95_v0  ;;  %v92_v4 = vld [vmem:[#allocation5 + $0x8] sm:$0xff]  ;;  %v97_v5 = vld [vmem:[#allocation7 + $0x10] sm:$0xff] }
  0x3a   :  { %v98_v6 = vld [vmem:[#allocation7 + $0x18] sm:$0xff]  ;;  %v721_v7 = vpack.c.bf16 %v92_v4, %v91_v2  ;;  %v93_v9 = vld [vmem:[#allocation5 + $0x10] sm:$0xff]  ;;  %v59_v11 = vld [vmem:[#allocation2] sm:$0xff] }
  0x3b   :  { %v717_v8 = vpack.c.bf16 %v98_v6, %v97_v5  ;;  %v94_v10 = vld [vmem:[#allocation5 + $0x18] sm:$0xff]  ;;  %714 = vmatprep.subr.bf16.mxu1 %v713_v3  ;;  %657 = vmatprep.mubr.msk.f32.mxu1 %vm99_vm0, %v59_v11  ;;  %v75_v13 = vmul.f32 %v59_v11, %v59_v11  ;;  %v60_v14 = vld [vmem:[#allocation2 + $0x8] sm:$0xff]  ;;  %v61_v15 = vld [vmem:[#allocation2 + $0x10] sm:$0xff] }
  0x3c   :  { %v725_v12 = vpack.c.bf16 %v94_v10, %v93_v9  ;;  %722 = vmatprep.subr.bf16.mxu0 %v721_v7  ;;  %716 = vmatpush3.bf16.msra.mxu1 %v713_v3  ;;  %v76_v16 = vmul.f32 %v60_v14, %v60_v14  ;;  %v77_v17 = vmul.f32 %v61_v15, %v61_v15  ;;  %v62_v18 = vld [vmem:[#allocation2 + $0x18] sm:$0xff]  ;;  %v63_v19 = vld [vmem:[#allocation2 + $0x20] sm:$0xff]  ;;  %v64_v22 = vld [vmem:[#allocation2 + $0x28] sm:$0xff] }
  0x3d   :  { %724 = vmatpush3.bf16.msra.mxu0 %v721_v7  ;;  %718 = vmatprep.subr.bf16.mxu1 %v717_v8  ;;  %v78_v20 = vmul.f32 %v62_v18, %v62_v18  ;;  %v79_v21 = vmul.f32 %v63_v19, %v63_v19  ;;  %v65_v23 = vld [vmem:[#allocation2 + $0x30] sm:$0xff]  ;;  %v80_v24 = vmul.f32 %v64_v22, %v64_v22  ;;  %v66_v26 = vld [vmem:[#allocation2 + $0x38] sm:$0xff]  ;;  %v67_v27 = vld [vmem:[#allocation2 + $0x40] sm:$0xff] }
  0x3e   :  { %726 = vmatprep.subr.bf16.mxu0 %v725_v12  ;;  %689 = vmatprep.mubr.msk.f32.mxu0 %vm99_vm0, %v75_v13  ;;  %v81_v25 = vmul.f32 %v65_v23, %v65_v23  ;;  %v82_v28 = vmul.f32 %v66_v26, %v66_v26  ;;  %v83_v29 = vmul.f32 %v67_v27, %v67_v27  ;;  %v68_v30 = vld [vmem:[#allocation2 + $0x48] sm:$0xff]  ;;  %v69_v31 = vld [vmem:[#allocation2 + $0x50] sm:$0xff]  ;;  %v70_v34 = vld [vmem:[#allocation2 + $0x58] sm:$0xff] }
  0x3f   :  { %v84_v32 = vmul.f32 %v68_v30, %v68_v30  ;;  %v85_v33 = vmul.f32 %v69_v31, %v69_v31  ;;  %v71_v35 = vld [vmem:[#allocation2 + $0x60] sm:$0xff]  ;;  %v86_v36 = vmul.f32 %v70_v34, %v70_v34  ;;  %v72_v38 = vld [vmem:[#allocation2 + $0x68] sm:$0xff]  ;;  %v73_v39 = vld [vmem:[#allocation2 + $0x70] sm:$0xff] }
  0x40   :  { %720 = vmatpush3.bf16.msra.mxu1 %v717_v8  ;;  %v87_v37 = vmul.f32 %v71_v35, %v71_v35  ;;  %v88_v40 = vmul.f32 %v72_v38, %v72_v38  ;;  %v89_v41 = vmul.f32 %v73_v39, %v73_v39  ;;  %v74_v42 = vld [vmem:[#allocation2 + $0x78] sm:$0xff]  ;;  %v968_v49 = vld [vmem:[%s1001_s3] ss:$0 sm:$0xff]  ;;  %s854_s3 = smov [#allocation8]  }
  0x41   :  { %728 = vmatpush3.bf16.msra.mxu0 %v725_v12  ;;  %v90_v43 = vmul.f32 %v74_v42, %v74_v42  ;;  %s566_s27 = sshll.u32 %s854_s3, 4  ;;  %s567_s27 = int_to_ptr.vmem [resolvable:$true] %s566_s27 }
  0x42   :  { %s821_s28 = scalar_lea.vmem %s567_s27, 16  ;;  %s825_s29 = scalar_lea.vmem %s567_s27, 32 }
  0x43   :  { %658 = vmatmul.mubr.msk.f32.vlgmr.msra.gmra.mrb[0].mxu1 %vm99_vm0, %v60_v14  ;;  %p822_p10 = scmp.ne.s32.totalorder %s567_s27, %s821_s28  ;;  %p826_p11 = scmp.lt.s32.totalorder %s567_s27, %s567_s27 }
  0x44   :  { %690 = vmatmul.mubr.msk.f32.vlgmr.msra.gmra.mrb[0].mxu0 %vm99_vm0, %v76_v16  ;;  %660 = vmatprep.mubr.msk.f32.mxu1 %vm99_vm0, %v61_v15  ;;  %p827_p12 = scmp.lt.s32.totalorder %s825_s29, %s821_s28 }
  0x45   :  { %692 = vmatprep.mubr.msk.f32.mxu0 %vm99_vm0, %v77_v17 }
  0x46   :  { %p828_p13 = por %p827_p12, %p826_p11 }
  0x47   :  { %661 = vmatmul.mubr.msk.f32.gmra.mrb[2].mxu1 %vm99_vm0, %v62_v18 }
  0x48   :  { %693 = vmatmul.mubr.msk.f32.gmra.mrb[2].mxu0 %vm99_vm0, %v78_v20  ;;  %663 = vmatprep.mubr.msk.f32.mxu1 %vm99_vm0, %v63_v19  ;;  %p829_p0 = pnand %p828_p13, %p822_p10 }
  0x49   :  { %695 = vmatprep.mubr.msk.f32.mxu0 %vm99_vm0, %v79_v21 }
  0x4b   :  { %664 = vmatmul.mubr.msk.f32.gmra.mrb[4].mxu1 %vm99_vm0, %v64_v22 }
  0x4c   :  { %696 = vmatmul.mubr.msk.f32.gmra.mrb[4].mxu0 %vm99_vm0, %v80_v24  ;;  %666 = vmatprep.mubr.msk.f32.mxu1 %vm99_vm0, %v65_v23 }
  0x4d   :  { %698 = vmatprep.mubr.msk.f32.mxu0 %vm99_vm0, %v81_v25 }
  0x4f   :  { %667 = vmatmul.mubr.msk.f32.gmra.mrb[6].mxu1 %vm99_vm0, %v66_v26 }
  0x50   :  { %699 = vmatmul.mubr.msk.f32.gmra.mrb[6].mxu0 %vm99_vm0, %v82_v28  ;;  %669 = vmatprep.mubr.msk.f32.mxu1 %vm99_vm0, %v67_v27 }
  0x51   :  { %701 = vmatprep.mubr.msk.f32.mxu0 %vm99_vm0, %v83_v29 }
  0x53   :  { %670 = vmatmul.mubr.msk.f32.gmra.mrb[8].mxu1 %vm99_vm0, %v68_v30 }
  0x54   :  { %702 = vmatmul.mubr.msk.f32.gmra.mrb[8].mxu0 %vm99_vm0, %v84_v32  ;;  %672 = vmatprep.mubr.msk.f32.mxu1 %vm99_vm0, %v69_v31 }
  0x55   :  { %704 = vmatprep.mubr.msk.f32.mxu0 %vm99_vm0, %v85_v33 }
  0x57   :  { %673 = vmatmul.mubr.msk.f32.gmra.mrb[10].mxu1 %vm99_vm0, %v70_v34 }
  0x58   :  { %705 = vmatmul.mubr.msk.f32.gmra.mrb[10].mxu0 %vm99_vm0, %v86_v36  ;;  %675 = vmatprep.mubr.msk.f32.mxu1 %vm99_vm0, %v71_v35 }
  0x59   :  { %707 = vmatprep.mubr.msk.f32.mxu0 %vm99_vm0, %v87_v37 }
  0x5b   :  { %676 = vmatmul.mubr.msk.f32.gmra.mrb[12].mxu1 %vm99_vm0, %v72_v38 }
  0x5c   :  { %708 = vmatmul.mubr.msk.f32.gmra.mrb[12].mxu0 %vm99_vm0, %v88_v40  ;;  %678 = vmatprep.mubr.msk.f32.mxu1 %vm99_vm0, %v73_v39 }
  0x5d   :  { %710 = vmatprep.mubr.msk.f32.mxu0 %vm99_vm0, %v89_v41 }
  0x5f   :  { %679 = vmatmul.mubr.msk.f32.gmra.mrb[14].mxu1 %vm99_vm0, %v74_v42 }
  0x60   :  { %711 = vmatmul.mubr.msk.f32.gmra.mrb[14].mxu0 %vm99_vm0, %v90_v43 }
 0x116   :  { %v659_v44 = vpop.f32.mrb[0].mxu1 }
 0x117   :  { %v691_v45 = vpop.f32.mrb[0].mxu0  ;;  %v214_v46 = vpop.f32.mrb[1].mxu1 }
 0x118   :  { %v413_v47 = vadd.f32 %v691_v45, %v659_v44  ;;  %v407_v48 = vpop.f32.mrb[1].mxu0 }
 0x119   :  { %v408_v50 = vadd.f32 %v407_v48, %v214_v46 }
 0x11a   :  { %v662_v51 = vpop.f32.mrb[2].mxu1  ;;  %v494_v59 = vadd.f32 %v968_v49, %v413_v47 }
 0x11b   :  { %v493_v52 = vadd.f32 %v968_v49, %v408_v50  ;;  %v694_v53 = vpop.f32.mrb[2].mxu0  ;;  %v224_v54 = vpop.f32.mrb[3].mxu1 }
 0x11c   :  { %v423_v55 = vadd.f32 %v694_v53, %v662_v51  ;;  %v417_v56 = vpop.f32.mrb[3].mxu0 }
 0x11d   :  { %509 = vxpose.xlu0.b32.start [1/16] (narrow) %v493_v52, 8  ;;  %v418_v57 = vadd.f32 %v417_v56, %v224_v54 }
 0x11e   :  { %v665_v58 = vpop.f32.mrb[4].mxu1  ;;  %v496_v9 = vadd.f32 %v968_v49, %v423_v55 }
 0x11f   :  { %v697_v60 = vpop.f32.mrb[4].mxu0  ;;  %v234_v61 = vpop.f32.mrb[5].mxu1  ;;  %v495_v0 = vadd.f32 %v968_v49, %v418_v57 }
 0x120   :  { %v433_v62 = vadd.f32 %v697_v60, %v665_v58  ;;  %v427_v63 = vpop.f32.mrb[5].mxu0 }
 0x121   :  { %510 = vxpose.xlu0.b32.cont [2/16] (narrow) %v494_v59, 8  ;;  %v428_v1 = vadd.f32 %v427_v63, %v234_v61 }
 0x122   :  { %v668_v2 = vpop.f32.mrb[6].mxu1  ;;  %v498_v23 = vadd.f32 %v968_v49, %v433_v62 }
 0x123   :  { %v700_v3 = vpop.f32.mrb[6].mxu0  ;;  %v244_v4 = vpop.f32.mrb[7].mxu1  ;;  %v497_v14 = vadd.f32 %v968_v49, %v428_v1 }
 0x124   :  { %v443_v5 = vadd.f32 %v700_v3, %v668_v2  ;;  %v437_v6 = vpop.f32.mrb[7].mxu0 }
 0x125   :  { %511 = vxpose.xlu0.b32.cont [3/16] (narrow) %v495_v0, 8  ;;  %v438_v7 = vadd.f32 %v437_v6, %v244_v4 }
 0x126   :  { %v671_v8 = vpop.f32.mrb[8].mxu1  ;;  %v500_v36 = vadd.f32 %v968_v49, %v443_v5 }
 0x127   :  { %v703_v10 = vpop.f32.mrb[8].mxu0  ;;  %v254_v11 = vpop.f32.mrb[9].mxu1  ;;  %v499_v28 = vadd.f32 %v968_v49, %v438_v7 }
 0x128   :  { %v453_v12 = vadd.f32 %v703_v10, %v671_v8  ;;  %v447_v13 = vpop.f32.mrb[9].mxu0 }
 0x129   :  { %512 = vxpose.xlu0.b32.cont [4/16] (narrow) %v496_v9, 8  ;;  %v448_v15 = vadd.f32 %v447_v13, %v254_v11 }
 0x12a   :  { %v674_v16 = vpop.f32.mrb[10].mxu1  ;;  %v502_v38 = vadd.f32 %v968_v49, %v453_v12 }
 0x12b   :  { %v706_v17 = vpop.f32.mrb[10].mxu0  ;;  %v264_v18 = vpop.f32.mrb[11].mxu1  ;;  %v501_v37 = vadd.f32 %v968_v49, %v448_v15 }
 0x12c   :  { %v463_v19 = vadd.f32 %v706_v17, %v674_v16  ;;  %v457_v20 = vpop.f32.mrb[11].mxu0 }
 0x12d   :  { %513 = vxpose.xlu0.b32.cont [5/16] (narrow) %v497_v14, 8  ;;  %v458_v21 = vadd.f32 %v457_v20, %v264_v18 }
 0x12e   :  { %v677_v22 = vpop.f32.mrb[12].mxu1  ;;  %v504_v40 = vadd.f32 %v968_v49, %v463_v19 }
 0x12f   :  { %v709_v24 = vpop.f32.mrb[12].mxu0  ;;  %v274_v25 = vpop.f32.mrb[13].mxu1  ;;  %v503_v39 = vadd.f32 %v968_v49, %v458_v21 }
 0x130   :  { %v473_v26 = vadd.f32 %v709_v24, %v677_v22  ;;  %v467_v27 = vpop.f32.mrb[13].mxu0 }
 0x131   :  { %514 = vxpose.xlu0.b32.cont [6/16] (narrow) %v498_v23, 8  ;;  %v468_v29 = vadd.f32 %v467_v27, %v274_v25 }
 0x132   :  { %v680_v30 = vpop.f32.mrb[14].mxu1  ;;  %v506_v42 = vadd.f32 %v968_v49, %v473_v26 }
 0x133   :  { %v712_v31 = vpop.f32.mrb[14].mxu0  ;;  %v284_v32 = vpop.f32.mrb[15].mxu1  ;;  %v505_v41 = vadd.f32 %v968_v49, %v468_v29 }
 0x134   :  { %v483_v33 = vadd.f32 %v712_v31, %v680_v30  ;;  %v477_v34 = vpop.f32.mrb[15].mxu0 }
 0x135   :  { %515 = vxpose.xlu0.b32.cont [7/16] (narrow) %v499_v28, 8  ;;  %v478_v35 = vadd.f32 %v477_v34, %v284_v32 }
 0x136   :  { %v508_v44 = vadd.f32 %v968_v49, %v483_v33 }
 0x137   :  { %v507_v43 = vadd.f32 %v968_v49, %v478_v35 }
 0x139   :  { %516 = vxpose.xlu0.b32.cont [8/16] (narrow) %v500_v36, 8 }
 0x13d   :  { %517 = vxpose.xlu0.b32.cont [9/16] (narrow) %v501_v37, 8 }
 0x141   :  { %518 = vxpose.xlu0.b32.cont [10/16] (narrow) %v502_v38, 8 }
 0x145   :  { %519 = vxpose.xlu0.b32.cont [11/16] (narrow) %v503_v39, 8 }
 0x149   :  { %520 = vxpose.xlu0.b32.cont [12/16] (narrow) %v504_v40, 8 }
 0x14d   :  { %521 = vxpose.xlu0.b32.cont [13/16] (narrow) %v505_v41, 8 }
 0x151   :  { %522 = vxpose.xlu0.b32.cont [14/16] (narrow) %v506_v42, 8 }
 0x155   :  { %523 = vxpose.xlu0.b32.cont [15/16] (narrow) %v507_v43, 8 }
 0x159   :  { %524 = vxpose.xlu0.b32.end [16/16] (narrow) %v508_v44, 8 }
 0x19d   :  { %v525_v45 = vpop.trf.xlu0 }
 0x19e   :  { %v541_v46 = vrot.slane %v525_v45, 4 }
 0x1a0   :  { %v542_v47 = vmax.f32 %v525_v45, %v541_v46 }
 0x1a2   :  { %v543_v48 = vrot.slane %v542_v47, 2 }
 0x1a4   :  { %v544_v50 = vmax.f32 %v542_v47, %v543_v48 }
 0x1a6   :  { %v545_v51 = vrot.slane %v544_v50, 1 }
 0x1a8   :  { %v546_v52 = vmax.f32 %v544_v50, %v545_v51 }
 0x1aa   :  { %v547_v53 = vsub.f32 %v525_v45, %v546_v52 }
 0x1ac   :  { %v548_v54 = vmul.f32 1.442695, %v547_v53 }
 0x1ae   :  { %751 = vpow2.f32 %v548_v54 }
 0x1b8   :  { %v752_v55 = vpop.eup %751 }
 0x1b9   :  { %v550_v56 = vrot.slane %v752_v55, 4 }
 0x1bb   :  { %v551_v57 = vadd.f32 %v752_v55, %v550_v56 }
 0x1bd   :  { %v552_v58 = vrot.slane %v551_v57, 2 }
 0x1bf   :  { %v553_v59 = vadd.f32 %v552_v58, %v551_v57 }
 0x1c1   :  { %v554_v60 = vrot.slane %v553_v59, 1 }
 0x1c3   :  { %v555_v61 = vadd.f32 %v554_v60, %v553_v59 }
 0x1c5   :  { %753 = vlog2.f32 %v555_v61 }
 0x1cf   :  { %v754_v49 = vpop.eup %753 }
 0x1d0   :  { %v557_v62 = vmul.f32 0.6931472, %v754_v49 }
 0x1d2   :  { %v558_v63 = vadd.f32 %v557_v62, %v546_v52 }
 0x1d4   :  { %559 = vst [vmem:[#allocation8] sm:$0x1] %v558_v63 }
 0x1d5   :  { %832 = shalt.err (!%p829_p0)
}
 0x1d6   :  { %s833_s6 = scalar_lea.hbm %s1002_s4, 16 }
 0x1d7   :  { %p834_p1 = scmp.ne.s32.totalorder %s1002_s4, %s833_s6  ;;  %p837_p2 = scmp.lt.u32.totalorder %s833_s6, %s1002_s4 }
 0x1d9   :  { %p839_p3 = pnand %p837_p2, %p834_p1 }
 0x1db   :  { %842 = shalt.err (!%p839_p3)
}
 0x1dc   :  { %569 = dma.vmem_to_hbm [thread:$0]  %s567_s27, 16, %s1002_s4, [#allocation4]  }
 0x1dd   :  { %847 = dma.done.wait [#allocation4], 16  }
 0x1de   :  { %848 = vsyncadd [#allocation4], 4294967280 }
 0x1df   :  { %573 = vsyncpa [#allocation3], 1 }
 0x1e0   :  { %574 = vsyncpa [#allocation6], 1 }
 0x1e1   :  { %575 = vsyncpa [#allocation4], 1 }

</bundles_post_ra>
